<compile_context>
chip_gen: v5e
topology: v5e:2x2
jax: 0.10.0
libtpu: 0.0.40
codegen_flags: <defaults>
</compile_context>

<pallas_src>
import functools

import jax
import jax.numpy as jnp
from jax.experimental import pallas as pl
from jax.experimental.pallas import tpu as pltpu


_NEG_LARGE = -1e30  # finite "-inf" for masked (padded) logit columns


def _round_up(x, m):
    return ((x + m - 1) // m) * m


def _cdiv(a, b):
    return (a + b - 1) // b


def _vmem_limit_bytes():
    """Per-generation VMEM budget with headroom (v7x: 64 MiB, v5e/v6e: 128 MiB)."""
    cap = 128 * 1024 * 1024
    try:
        cap = int(pltpu.get_tpu_info().vmem_capacity_bytes)
    except Exception:
        pass
    return max(16 * 1024 * 1024, min(int(cap * 0.6), 96 * 1024 * 1024))


def _choose_tm(M, max_tm=512):
    """Row tile: multiple of 8, minimal pad waste, >=2 blocks when M >= 16."""
    tm = min(max_tm, _round_up(M, 8))
    if M >= 16:
        # Guarantee at least 2 M-blocks so the 'parallel' axis can shard across
        # the two v7x TensorCores (harmless on single-TC v5e/v6e).
        tm = min(tm, _round_up(_cdiv(M, 2), 8))
    n_blocks = _cdiv(M, tm)
    tm = _round_up(_cdiv(M, n_blocks), 8)   # shrink to avoid near-full-tile padding
    return tm


def _pick_tile(total, candidates):
    """Largest candidate that exactly divides `total` (total is a multiple of 128)."""
    for c in candidates:
        if total % c == 0:
            return c
    return 128


def _apply_activation(z, activation):
    if activation is None or activation is False:
        return z
    a = activation.lower() if isinstance(activation, str) else activation
    if a == "relu":
        return jnp.maximum(z, 0.0)
    if a == "tanh":
        return jnp.tanh(z)
    if a == "sigmoid":
        return jax.nn.sigmoid(z)
    if a == "selu":
        return jax.nn.selu(z)
    raise ValueError(f"Unsupported activation: {activation}")


# -----------------------------------------------------------------------------
# One-time parameter preparation (hoisted out of the forward pass).
# -----------------------------------------------------------------------------
def prepare_params(params, *, compute_dtype=jnp.bfloat16):
    """Pad weights/biases to lane multiples and cast weights to bf16 once.

    params: list of (W [in, out], b [out]).
    Zero padding on both weight axes guarantees padded rows/cols contribute 0.
    """
    prepped = []
    for w, b in params:
        K, N = w.shape
        Kp, Np = _round_up(K, 128), _round_up(N, 128)
        wp = jnp.pad(w.astype(compute_dtype), ((0, Kp - K), (0, Np - N)))
        bp = jnp.pad(b.astype(jnp.float32), (0, Np - N)).reshape(1, Np)
        prepped.append(dict(w=wp, b=bp, K=K, N=N, Kp=Kp, Np=Np))
    return prepped


# -----------------------------------------------------------------------------
# Fully fused MLP kernel: all layers + bias + ReLU + log_softmax in one call.
# -----------------------------------------------------------------------------
def _fused_mlp_kernel(*refs, n_layers, n_out_valid, activation):
    # refs = (x_ref, w1, b1, ..., wL, bL, out_ref)
    x_ref = refs[0]
    o_ref = refs[-1]

    h = x_ref[...]                                   # bf16 (MXU operand)
    logits = None
    for l in range(n_layers):
        w_ref = refs[1 + 2 * l]
        b_ref = refs[2 + 2 * l]
        z = jnp.dot(h, w_ref[...], preferred_element_type=jnp.float32)
        z = z + b_ref[...]                           # f32 epilogue (v5e-safe)
        if l < n_layers - 1:
            z = _apply_activation(z, activation)
            h = z.astype(jnp.bfloat16)               # bf16 operand for next matmul
        else:
            logits = z

    # log_softmax over the valid (unpadded) columns only.
    col = jax.lax.broadcasted_iota(jnp.int32, logits.shape, 1)
    logits = jnp.where(col < n_out_valid, logits, _NEG_LARGE)
    m = jnp.max(logits, axis=-1, keepdims=True)
    s = logits - m
    lse = jnp.log(jnp.sum(jnp.exp(s), axis=-1, keepdims=True))
    o_ref[...] = (s - lse).astype(o_ref.dtype)


def _fused_fits(M, prepped, vmem_limit):
    tm = _choose_tm(M)
    k0p = prepped[0]["Kp"]
    nlp = prepped[-1]["Np"]
    max_np = max(p["Np"] for p in prepped)
    weight_bytes = sum(p["Kp"] * p["Np"] * 2 + p["Np"] * 4 for p in prepped)
    tile_bytes = tm * k0p * 2 + tm * nlp * 4         # x tile (bf16) + out tile (f32)
    interm_bytes = 2 * tm * max_np * 4               # in-flight f32 intermediates
    # x2 for (conservative) double buffering of every input/output block.
    return 2 * (weight_bytes + tile_bytes) + interm_bytes < 0.7 * vmem_limit


def _fused_forward(x2d, prepped, *, activation, vmem_limit):
    M, K0 = x2d.shape
    K0p = prepped[0]["Kp"]
    NL, NLp = prepped[-1]["N"], prepped[-1]["Np"]
    tm = _choose_tm(M)
    Mp = _round_up(M, tm)

    xp = x2d.astype(jnp.bfloat16)
    if Mp != M or K0p != K0:
        xp = jnp.pad(xp, ((0, Mp - M), (0, K0p - K0)))

    in_specs = [pl.BlockSpec((tm, K0p), lambda i: (i, 0))]
    args = [xp]
    for p in prepped:
        in_specs.append(pl.BlockSpec((p["Kp"], p["Np"]), lambda i: (0, 0)))  # resident W
        in_specs.append(pl.BlockSpec((1, p["Np"]), lambda i: (0, 0)))        # resident b
        args.append(p["w"])
        args.append(p["b"])

    kernel = functools.partial(
        _fused_mlp_kernel,
        n_layers=len(prepped),
        n_out_valid=NL,
        activation=activation,
    )

    yp = pl.pallas_call(
        kernel,
        out_shape=jax.ShapeDtypeStruct((Mp, NLp), jnp.float32),
        grid_spec=pltpu.PrefetchScalarGridSpec(
            num_scalar_prefetch=0,
            grid=(Mp // tm,),
            in_specs=in_specs,
            out_specs=pl.BlockSpec((tm, NLp), lambda i: (i, 0)),   # lane-dense out
        ),
        compiler_params=pltpu.CompilerParams(
            dimension_semantics=("parallel",),
            vmem_limit_bytes=vmem_limit,
        ),
    )(*args)
    return yp[:M, :NL]


# -----------------------------------------------------------------------------
# Fallback: per-layer fused Linear (+ bias, + ReLU, + optional log_softmax).
# -----------------------------------------------------------------------------
def _linear_kernel(x_ref, w_ref, b_ref, o_ref, acc_ref, *,
                   activation, fuse_log_softmax, n_out_valid):
    @pl.when(pl.program_id(2) == 0)
    def _():
        acc_ref[...] = jnp.zeros_like(acc_ref)

    acc_ref[...] += jnp.dot(
        x_ref[...], w_ref[...], preferred_element_type=jnp.float32
    )

    @pl.when(pl.program_id(2) == pl.num_programs(2) - 1)
    def _():
        out = acc_ref[...] + b_ref[...]              # f32 epilogue
        out = _apply_activation(out, activation)
        if fuse_log_softmax:                         # last layer: single N tile
            col = jax.lax.broadcasted_iota(jnp.int32, out.shape, 1)
            out = jnp.where(col < n_out_valid, out, _NEG_LARGE)
            m = jnp.max(out, axis=-1, keepdims=True)
            s = out - m
            lse = jnp.log(jnp.sum(jnp.exp(s), axis=-1, keepdims=True))
            out = s - lse
        o_ref[...] = out.astype(o_ref.dtype)


def _linear_layer_call(h, p, *, tm, activation, fuse_log_softmax, out_dtype,
                       vmem_limit):
    Mp = h.shape[0]
    Kp, Np = p["Kp"], p["Np"]
    tn = Np if fuse_log_softmax else _pick_tile(Np, (512, 256, 128))
    tk = _pick_tile(Kp, (1024, 512, 256, 128))

    kernel = functools.partial(
        _linear_kernel,
        activation=activation,
        fuse_log_softmax=fuse_log_softmax,
        n_out_valid=p["N"],
    )

    return pl.pallas_call(
        kernel,
        out_shape=jax.ShapeDtypeStruct((Mp, Np), out_dtype),
        grid_spec=pltpu.PrefetchScalarGridSpec(
            num_scalar_prefetch=0,
            grid=(Mp // tm, Np // tn, Kp // tk),
            in_specs=[
                pl.BlockSpec((tm, tk), lambda i, j, k: (i, k)),   # x tile (bf16)
                pl.BlockSpec((tk, tn), lambda i, j, k: (k, j)),   # w tile (bf16)
                pl.BlockSpec((1, tn), lambda i, j, k: (0, j)),    # bias row (f32)
            ],
            out_specs=pl.BlockSpec((tm, tn), lambda i, j, k: (i, j)),
            scratch_shapes=[pltpu.VMEM((tm, tn), jnp.float32)],
        ),
        compiler_params=pltpu.CompilerParams(
            dimension_semantics=("parallel", "parallel", "arbitrary"),
            vmem_limit_bytes=vmem_limit,
        ),
    )(h, p["w"], p["b"])


def _log_softmax_kernel(x_ref, o_ref, *, n_valid):
    x = x_ref[...].astype(jnp.float32)
    col = jax.lax.broadcasted_iota(jnp.int32, x.shape, 1)
    x = jnp.where(col < n_valid, x, _NEG_LARGE)
    m = jnp.max(x, axis=-1, keepdims=True)
    s = x - m
    lse = jnp.log(jnp.sum(jnp.exp(s), axis=-1, keepdims=True))
    o_ref[...] = (s - lse).astype(o_ref.dtype)


def _log_softmax_call(logits_padded, *, n_valid, tm, vmem_limit):
    """Lane-dense log_softmax on N-padded logits; caller slices to n_valid."""
    Mp, Np = logits_padded.shape
    kernel = functools.partial(_log_softmax_kernel, n_valid=n_valid)
    return pl.pallas_call(
        kernel,
        out_shape=jax.ShapeDtypeStruct((Mp, Np), jnp.float32),
        grid_spec=pltpu.PrefetchScalarGridSpec(
            num_scalar_prefetch=0,
            grid=(Mp // tm,),
            in_specs=[pl.BlockSpec((tm, Np), lambda i: (i, 0))],
            out_specs=pl.BlockSpec((tm, Np), lambda i: (i, 0)),
        ),
        compiler_params=pltpu.CompilerParams(
            dimension_semantics=("parallel",),
            vmem_limit_bytes=vmem_limit,
        ),
    )(logits_padded)


def _per_layer_forward(x2d, prepped, *, activation, vmem_limit):
    M, K0 = x2d.shape
    K0p = prepped[0]["Kp"]
    tm = _choose_tm(M)
    Mp = _round_up(M, tm)

    h = x2d.astype(jnp.bfloat16)
    if Mp != M or K0p != K0:
        h = jnp.pad(h, ((0, Mp - M), (0, K0p - K0)))

    n_layers = len(prepped)
    for idx, p in enumerate(prepped):
        is_last = idx == n_layers - 1
        act = None if is_last else activation
        fuse_ls = is_last and p["Np"] <= 2048        # classification heads: always
        out_dtype = jnp.float32 if is_last else jnp.bfloat16
        h = _linear_layer_call(
            h, p, tm=tm, activation=act, fuse_log_softmax=fuse_ls,
            out_dtype=out_dtype, vmem_limit=vmem_limit)
        if is_last and not fuse_ls:
            h = _log_softmax_call(h, n_valid=p["N"], tm=tm, vmem_limit=vmem_limit)
    return h[:M, :prepped[-1]["N"]]


# -----------------------------------------------------------------------------
# MLPclassify forward.
# -----------------------------------------------------------------------------
def mlp_classify_forward(inputs, masks, params, *, flatten=True,
                         activation="relu", force_per_layer=False):
    """params: prepare_params(...) output, or a raw list of (W [in,out], b [out])."""
    if params and isinstance(params[0], (tuple, list)):
        params = prepare_params(params)              # convenience (not hoisted)

    x = inputs
    if flatten:
        x = x.reshape(x.shape[0], -1)
    M = x.shape[0]

    vmem_limit = _vmem_limit_bytes()
    if not force_per_layer and _fused_fits(M, params, vmem_limit):
        log_probs = _fused_forward(x, params, activation=activation,
                                   vmem_limit=vmem_limit)
    else:
        log_probs = _per_layer_forward(x, params, activation=activation,
                                       vmem_limit=vmem_limit)
    return log_probs, masks


# -----------------------------------------------------------------------------
# References + demo / correctness check.
# -----------------------------------------------------------------------------
def _reference_forward_f32(inputs, masks, params):
    x = inputs.reshape(inputs.shape[0], -1).astype(jnp.float32)
    for idx, (w, b) in enumerate(params):
        x = jnp.matmul(x, w, precision=jax.lax.Precision.HIGHEST) + b
        if idx < len(params) - 1:
            x = jnp.maximum(x, 0.0)
    return jax.nn.log_softmax(x, axis=1), masks


def _reference_forward_bf16(inputs, masks, params):
    # Numerically matched to the kernels: bf16 MXU operands, f32 accumulate.
    x = inputs.reshape(inputs.shape[0], -1)
    for idx, (w, b) in enumerate(params):
        x = jnp.dot(x.astype(jnp.bfloat16), w.astype(jnp.bfloat16),
                    preferred_element_type=jnp.float32) + b
        if idx < len(params) - 1:
            x = jnp.maximum(x, 0.0)
    return jax.nn.log_softmax(x, axis=1), masks


if __name__ == "__main__":
    key = jax.random.PRNGKey(0)
    k_in, k_w1, k_b1, k_w2, k_b2, k_m = jax.random.split(key, 6)

    # Small shapes consistent with the module: image-like input flattened to an
    # MLP; hidden_dims=[32], output_dim=10.
    B, C, H, W = 2, 4, 16, 16
    input_dim = C * H * W          # 1024 after flatten
    hidden_dim = 32
    output_dim = 10

    inputs = jax.random.normal(k_in, (B, C, H, W), dtype=jnp.float32)
    masks = jax.random.bernoulli(k_m, 0.5, (B, output_dim)).astype(jnp.float32)

    # Deterministic weight init (stand-in for nn.Linear.reset_parameters).
    w1 = jax.random.normal(k_w1, (input_dim, hidden_dim), jnp.float32) / jnp.sqrt(input_dim)
    b1 = jax.random.normal(k_b1, (hidden_dim,), jnp.float32) * 0.01
    w2 = jax.random.normal(k_w2, (hidden_dim, output_dim), jnp.float32) / jnp.sqrt(hidden_dim)
    b2 = jax.random.normal(k_b2, (output_dim,), jnp.float32) * 0.01
    params = [(w1, b1), (w2, b2)]

    # One-time weight pad + bf16 cast (hoisted out of the forward pass).
    prepped = prepare_params(params)

    # Fully fused whole-network path (weights resident in VMEM).
    log_probs, masks_out = mlp_classify_forward(inputs, masks, prepped)
    log_probs = jax.block_until_ready(log_probs)

    # Per-layer fallback path (exercised for coverage).
    log_probs_pl, _ = mlp_classify_forward(inputs, masks, prepped,
                                           force_per_layer=True)
    log_probs_pl = jax.block_until_ready(log_probs_pl)

    ref_bf16, _ = _reference_forward_bf16(inputs, masks, params)
    ref_f32, ref_masks = _reference_forward_f32(inputs, masks, params)

    assert log_probs.shape == (B, output_dim)
    # Tight check vs. a numerically matched bf16-operand reference.
    assert jnp.allclose(log_probs, ref_bf16, atol=2e-3, rtol=2e-3)
    assert jnp.allclose(log_probs_pl, ref_bf16, atol=2e-3, rtol=2e-3)
    # Loose sanity check vs. the full-f32 HIGHEST-precision reference.
    assert jnp.allclose(log_probs, ref_f32, atol=5e-2, rtol=5e-2)
    assert jnp.array_equal(masks_out, ref_masks)

    # Standalone lane-dense log_softmax kernel (used only when the final layer
    # can't fuse it) — quick correctness check.
    logits_test = jax.random.normal(jax.random.PRNGKey(1), (8, 128), jnp.float32)
    ls = _log_softmax_call(logits_test, n_valid=10, tm=8,
                           vmem_limit=_vmem_limit_bytes())
    ls = jax.block_until_ready(ls)
    ref_ls = jax.nn.log_softmax(logits_test[:, :10], axis=1)
    assert jnp.allclose(ls[:, :10], ref_ls, atol=1e-4, rtol=1e-4)

    print("KERNEL_OK")
</pallas_src>

<mosaic_0001>
module attributes {stable_mosaic.version = 11 : i64} {
  func.func @_fused_mlp_kernel(%arg0: i32, %arg1: memref<8x1024xbf16, #tpu.memory_space<vmem>>, %arg2: memref<1024x128xbf16, #tpu.memory_space<vmem>>, %arg3: memref<1x128xf32, #tpu.memory_space<vmem>>, %arg4: memref<128x128xbf16, #tpu.memory_space<vmem>>, %arg5: memref<1x128xf32, #tpu.memory_space<vmem>>, %arg6: memref<8x128xf32, #tpu.memory_space<vmem>>) attributes {dimension_semantics = [#tpu.dimension_semantics<parallel>], iteration_bounds = array<i64: 1>, scalar_prefetch = 0 : i64, scratch_operands = 0 : i64, tpu.core_type = #tpu.core_type<tc>, window_params = [{transform_indices = @transform_0, window_bounds = array<i64: 8, 1024>}, {pipeline_mode = #tpu.pipeline_mode<synchronous>, transform_indices = @transform_1, window_bounds = array<i64: 1024, 128>}, {pipeline_mode = #tpu.pipeline_mode<synchronous>, transform_indices = @transform_2, window_bounds = array<i64: 1, 128>}, {pipeline_mode = #tpu.pipeline_mode<synchronous>, transform_indices = @transform_3, window_bounds = array<i64: 128, 128>}, {pipeline_mode = #tpu.pipeline_mode<synchronous>, transform_indices = @transform_4, window_bounds = array<i64: 1, 128>}, {transform_indices = @transform_5, window_bounds = array<i64: 8, 128>}]} {
    %c0 = arith.constant 0 : index
    %c0_0 = arith.constant 0 : index
    %0 = vector.load %arg1[%c0, %c0_0] : memref<8x1024xbf16, #tpu.memory_space<vmem>>, vector<8x1024xbf16>
    %c0_1 = arith.constant 0 : index
    %c0_2 = arith.constant 0 : index
    %1 = vector.load %arg2[%c0_1, %c0_2] : memref<1024x128xbf16, #tpu.memory_space<vmem>>, vector<1024x128xbf16>
    %cst = arith.constant dense<0.000000e+00> : vector<8x128xf32>
    %2 = tpu.matmul %0, %1, %cst {dimension_numbers = #tpu.dot_dimension_numbers<[1], [0], [0], [1], [0, 0, 1, 1], [], []>} : vector<8x1024xbf16>, vector<1024x128xbf16>, vector<8x128xf32> -> vector<8x128xf32>
    %c0_3 = arith.constant 0 : index
    %c0_4 = arith.constant 0 : index
    %3 = vector.load %arg3[%c0_3, %c0_4] : memref<1x128xf32, #tpu.memory_space<vmem>>, vector<1x128xf32>
    %4 = vector.broadcast %3 : vector<1x128xf32> to vector<8x128xf32>
    %5 = arith.addf %2, %4 : vector<8x128xf32>
    %cst_5 = arith.constant 0.000000e+00 : f32
    %6 = vector.broadcast %cst_5 : f32 to vector<8x128xf32>
    %7 = arith.maximumf %5, %6 : vector<8x128xf32>
    %8 = arith.truncf %7 : vector<8x128xf32> to vector<8x128xbf16>
    %c0_6 = arith.constant 0 : index
    %c0_7 = arith.constant 0 : index
    %9 = vector.load %arg4[%c0_6, %c0_7] : memref<128x128xbf16, #tpu.memory_space<vmem>>, vector<128x128xbf16>
    %cst_8 = arith.constant dense<0.000000e+00> : vector<8x128xf32>
    %10 = tpu.matmul %8, %9, %cst_8 {dimension_numbers = #tpu.dot_dimension_numbers<[1], [0], [0], [1], [0, 0, 1, 1], [], []>} : vector<8x128xbf16>, vector<128x128xbf16>, vector<8x128xf32> -> vector<8x128xf32>
    %c0_9 = arith.constant 0 : index
    %c0_10 = arith.constant 0 : index
    %11 = vector.load %arg5[%c0_9, %c0_10] : memref<1x128xf32, #tpu.memory_space<vmem>>, vector<1x128xf32>
    %12 = vector.broadcast %11 : vector<1x128xf32> to vector<8x128xf32>
    %13 = arith.addf %10, %12 : vector<8x128xf32>
    %14 = tpu.iota {dimensions = array<i32: 1>} : vector<8x128xi32>
    %c10_i32 = arith.constant 10 : i32
    %15 = vector.broadcast %c10_i32 : i32 to vector<8x128xi32>
    %16 = arith.cmpi slt, %14, %15 : vector<8x128xi32>
    %cst_11 = arith.constant -1.000000e+30 : f32
    %17 = vector.broadcast %cst_11 : f32 to vector<8x128xf32>
    %18 = arith.select %16, %13, %17 : vector<8x128xi1>, vector<8x128xf32>
    %cst_12 = arith.constant dense<0xFF800000> : vector<8xf32>
    %19 = vector.multi_reduction <maximumf>, %18, %cst_12 [1] : vector<8x128xf32> to vector<8xf32>
    %20 = vector.shape_cast %19 : vector<8xf32> to vector<8x1xf32>
    %21 = vector.broadcast %20 : vector<8x1xf32> to vector<8x128xf32>
    %22 = arith.subf %18, %21 : vector<8x128xf32>
    %23 = math.exp %22 : vector<8x128xf32>
    %cst_13 = arith.constant dense<0.000000e+00> : vector<8xf32>
    %24 = vector.multi_reduction <add>, %23, %cst_13 [1] : vector<8x128xf32> to vector<8xf32>
    %25 = vector.shape_cast %24 : vector<8xf32> to vector<8x1xf32>
    %26 = math.log %25 : vector<8x1xf32>
    %27 = vector.broadcast %26 : vector<8x1xf32> to vector<8x128xf32>
    %28 = arith.subf %22, %27 : vector<8x128xf32>
    %c0_14 = arith.constant 0 : index
    %c0_15 = arith.constant 0 : index
    %29 = vector.load %arg6[%c0_14, %c0_15] : memref<8x128xf32, #tpu.memory_space<vmem>>, vector<8x128xf32>
    tpu.vector_store %arg6[%c0_14, %c0_15], %28 {strides = array<i32>} : memref<8x128xf32, #tpu.memory_space<vmem>>, vector<8x128xf32>,
    return
  }
  func.func @transform_0(%arg0: i32) -> (i32, i32) {
    %c0_i32 = arith.constant 0 : i32
    %c0_i32_0 = arith.constant 0 : i32
    return %arg0, %c0_i32 : i32, i32
  }
  func.func @transform_1(%arg0: i32) -> (i32, i32) {
    %c0_i32 = arith.constant 0 : i32
    %c0_i32_0 = arith.constant 0 : i32
    %c0_i32_1 = arith.constant 0 : i32
    return %c0_i32, %c0_i32_0 : i32, i32
  }
  func.func @transform_2(%arg0: i32) -> (i32, i32) {
    %c0_i32 = arith.constant 0 : i32
    %c0_i32_0 = arith.constant 0 : i32
    %c0_i32_1 = arith.constant 0 : i32
    return %c0_i32, %c0_i32_0 : i32, i32
  }
  func.func @transform_3(%arg0: i32) -> (i32, i32) {
    %c0_i32 = arith.constant 0 : i32
    %c0_i32_0 = arith.constant 0 : i32
    %c0_i32_1 = arith.constant 0 : i32
    return %c0_i32, %c0_i32_0 : i32, i32
  }
  func.func @transform_4(%arg0: i32) -> (i32, i32) {
    %c0_i32 = arith.constant 0 : i32
    %c0_i32_0 = arith.constant 0 : i32
    %c0_i32_1 = arith.constant 0 : i32
    return %c0_i32, %c0_i32_0 : i32, i32
  }
  func.func @transform_5(%arg0: i32) -> (i32, i32) {
    %c0_i32 = arith.constant 0 : i32
    %c0_i32_0 = arith.constant 0 : i32
    return %arg0, %c0_i32 : i32, i32
  }
}

</mosaic_0001>

<bundles_post_ra>
// kernel: tpu_custom_call.1
= control target key start
LH: loop header
LB: loop body
LE: loop exit
PB: predicated region body
PF: predicated region fallthrough
CT: control target
= control target key end

     0   :  { %10 = vsyncpa [#allocation3], 0  ;;  %s1362_s0 = inlined_call_operand.hbm [shape: bf16[8,1024], index: 0, kind: input, shape index: {}]   ;;  %s1363_s1 = inlined_call_operand.hbm [shape: bf16[1024,128], index: 1, kind: input, shape index: {}]   ;;  %s1364_s2 = inlined_call_operand.vmem [shape: f32[1,128], index: 2, kind: input, shape index: {}]   ;;  %s1365_s3 = inlined_call_operand.hbm [shape: bf16[128,128], index: 3, kind: input, shape index: {}]   ;;  %s1366_s4 = inlined_call_operand.vmem [shape: f32[1,128], index: 4, kind: input, shape index: {}]   ;;  %s1367_s5 = inlined_call_operand.hbm [shape: f32[8,128], index: 5, kind: output, shape index: {}]  }
   0x1   :  { %11 = vsyncpa [#allocation6], 0  ;;  %s28_s20 = sshll.u32 %s1363_s1, 4  ;;  %s29_s20 = int_to_ptr.hbm [resolvable:$true] %s28_s20 }
   0x2   :  { %12 = vsyncpa [#allocation4], 0  ;;  %s1308_s21 = smov [#allocation5]   ;;  %s18_s25 = sshll.u32 %s1362_s0, 4  ;;  %s19_s25 = int_to_ptr.hbm [resolvable:$true] %s18_s25 }
   0x3   :  { %s30_s22 = sshll.u32 %s1308_s21, 4  ;;  %s1309_s26 = smov 64   ;;  %s31_s22 = int_to_ptr.vmem [resolvable:$true] %s30_s22 }
   0x4   :  { %s1310_s27 = smov 4   ;;  %s1311_s28 = smov [#allocation2]  }
   0x5   :  { %36 = dma.hbm_to_vmem [thread:$0]  %s29_s20, 8192, %s31_s22, [#allocation6], %s1309_s26, %s1309_s26, %s1310_s27  }
   0x6   :  { %s20_s29 = sshll.u32 %s1311_s28, 4  ;;  %s43_s7 = sshll.u32 %s1365_s3, 4  ;;  %s21_s29 = int_to_ptr.vmem [resolvable:$true] %s20_s29  ;;  %s44_s7 = int_to_ptr.hbm [resolvable:$true] %s43_s7 }
   0x7   :  { %23 = dma.hbm_to_vmem [thread:$0]  %s19_s25, 512, %s21_s29, [#allocation3]  }
   0x8   :  { %s1312_s1 = smov [#allocation7]  }
   0x9   :  { %s45_s8 = sshll.u32 %s1312_s1, 4  ;;  %s46_s8 = int_to_ptr.vmem [resolvable:$true] %s45_s8 }
   0xa   :  { %51 = dma.hbm_to_vmem [thread:$0]  %s44_s7, 1024, %s46_s8, [#allocation6], %s1309_s26, %s1309_s26, %s1310_s27  }
   0xb   :  { %1302 = dma.done.wait [#allocation3], 512  }
   0xc   :  { %1303 = vsyncadd [#allocation3], 4294966784 }
   0xd   :  { %1304 = dma.done.wait [#allocation6], 9216  }
   0xe   :  { %1305 = vsyncadd [#allocation6], 4294958080  ;;  %v1129_v0 = vld [vmem:[#allocation5 + $0x38] sm:$0xff]  ;;  %v1128_v4 = vld [vmem:[#allocation5 + $0x30] sm:$0xff]  ;;  %s1313_s10 = smov [#allocation8]  }
   0xf   :  { %v1137_v1 = vld [vmem:[#allocation5 + $0x78] sm:$0xff]  ;;  %614 = vmatpush.bf16.msra.mxu0 %v1129_v0  ;;  %v1136_v5 = vld [vmem:[#allocation5 + $0x70] sm:$0xff]  ;;  %v1127_v8 = vld [vmem:[#allocation5 + $0x28] sm:$0xff]  ;;  %s821_s11 = sshll.u32 %s1313_s10, 4  ;;  %s822_s11 = int_to_ptr.vmem [resolvable:$true] %s821_s11 }
  0x10   :  { %v1145_v2 = vld [vmem:[#allocation5 + $0xb8] sm:$0xff]  ;;  %627 = vmatpush.bf16.msra.mxu1 %v1137_v1  ;;  %v1144_v6 = vld [vmem:[#allocation5 + $0xb0] sm:$0xff]  ;;  %v1135_v9 = vld [vmem:[#allocation5 + $0x68] sm:$0xff] }
  0x11   :  { %v1153_v3 = vld [vmem:[#allocation5 + $0xf8] sm:$0xff]  ;;  %640 = vmatpush.bf16.msra.mxu2 %v1145_v2  ;;  %v1152_v7 = vld [vmem:[#allocation5 + $0xf0] sm:$0xff]  ;;  %v1143_v10 = vld [vmem:[#allocation5 + $0xa8] sm:$0xff] }
  0x12   :  { %653 = vmatpush.bf16.msra.mxu3 %v1153_v3  ;;  %v1151_v11 = vld [vmem:[#allocation5 + $0xe8] sm:$0xff]  ;;  %v1126_v12 = vld [vmem:[#allocation5 + $0x20] sm:$0xff]  ;;  %v1125_v16 = vld [vmem:[#allocation5 + $0x18] sm:$0xff] }
  0x13   :  { %615 = vmatpush.bf16.msra.mxu0 %v1128_v4  ;;  %v1134_v13 = vld [vmem:[#allocation5 + $0x60] sm:$0xff]  ;;  %v1133_v17 = vld [vmem:[#allocation5 + $0x58] sm:$0xff]  ;;  %v1124_v20 = vld [vmem:[#allocation5 + $0x10] sm:$0xff] }
  0x14   :  { %628 = vmatpush.bf16.msra.mxu1 %v1136_v5  ;;  %v1142_v14 = vld [vmem:[#allocation5 + $0xa0] sm:$0xff]  ;;  %v1141_v18 = vld [vmem:[#allocation5 + $0x98] sm:$0xff]  ;;  %v1132_v21 = vld [vmem:[#allocation5 + $0x50] sm:$0xff] }
  0x15   :  { %641 = vmatpush.bf16.msra.mxu2 %v1144_v6  ;;  %v1150_v15 = vld [vmem:[#allocation5 + $0xe0] sm:$0xff]  ;;  %v1149_v19 = vld [vmem:[#allocation5 + $0xd8] sm:$0xff]  ;;  %v1140_v22 = vld [vmem:[#allocation5 + $0x90] sm:$0xff] }
  0x16   :  { %654 = vmatpush.bf16.msra.mxu3 %v1152_v7  ;;  %v1148_v23 = vld [vmem:[#allocation5 + $0xd0] sm:$0xff]  ;;  %v1123_v24 = vld [vmem:[#allocation5 + $0x8] sm:$0xff]  ;;  %v66_v29 = vld [vmem:[#allocation2] sm:$0xff] }
  0x17   :  { %616 = vmatpush.bf16.msra.mxu0 %v1127_v8  ;;  %v1131_v25 = vld [vmem:[#allocation5 + $0x48] sm:$0xff]  ;;  %v1122_v30 = vld [vmem:[#allocation5] sm:$0xff]  ;;  %v206_v33 = vunpack.c.l.b16 %v66_v29  ;;  %v207_v37 = vunpack.c.h.b16 %v66_v29  ;;  %v1161_v38 = vld [vmem:[#allocation5 + $0x138] sm:$0xff] }
  0x18   :  { %629 = vmatpush.bf16.msra.mxu1 %v1135_v9  ;;  %v1139_v26 = vld [vmem:[#allocation5 + $0x88] sm:$0xff]  ;;  %v1130_v31 = vld [vmem:[#allocation5 + $0x40] sm:$0xff]  ;;  %v1169_v39 = vld [vmem:[#allocation5 + $0x178] sm:$0xff] }
  0x19   :  { %642 = vmatpush.bf16.msra.mxu2 %v1143_v10  ;;  %v1147_v27 = vld [vmem:[#allocation5 + $0xc8] sm:$0xff]  ;;  %v1138_v34 = vld [vmem:[#allocation5 + $0x80] sm:$0xff]  ;;  %v1177_v40 = vld [vmem:[#allocation5 + $0x1b8] sm:$0xff]  ;;  %v214_v43 = vpack.c.b16 %v206_v33, %v206_v33  ;;  %v215_v45 = vpack.c.b16 %v207_v37, %v207_v37 }
  0x1a   :  { %655 = vmatpush.bf16.msra.mxu3 %v1151_v11  ;;  %v67_v28 = vld [vmem:[#allocation2 + $0x8] sm:$0xff]  ;;  %v1146_v35 = vld [vmem:[#allocation5 + $0xc0] sm:$0xff]  ;;  %v1185_v41 = vld [vmem:[#allocation5 + $0x1f8] sm:$0xff] }
  0x1b   :  { %617 = vmatpush.bf16.msra.mxu0 %v1126_v12  ;;  %v208_v32 = vunpack.c.l.b16 %v67_v28  ;;  %v209_v36 = vunpack.c.h.b16 %v67_v28  ;;  %v1160_v46 = vld [vmem:[#allocation5 + $0x130] sm:$0xff]  ;;  %v1159_v50 = vld [vmem:[#allocation5 + $0x128] sm:$0xff]  ;;  %v1158_v54 = vld [vmem:[#allocation5 + $0x120] sm:$0xff] }
  0x1c   :  { %630 = vmatpush.bf16.msra.mxu1 %v1134_v13  ;;  %v1168_v47 = vld [vmem:[#allocation5 + $0x170] sm:$0xff]  ;;  %v1167_v51 = vld [vmem:[#allocation5 + $0x168] sm:$0xff]  ;;  %v1166_v55 = vld [vmem:[#allocation5 + $0x160] sm:$0xff] }
  0x1d   :  { %643 = vmatpush.bf16.msra.mxu2 %v1142_v14  ;;  %v216_v42 = vpack.c.b16 %v208_v32, %v208_v32  ;;  %v217_v44 = vpack.c.b16 %v209_v36, %v209_v36  ;;  %v1176_v48 = vld [vmem:[#allocation5 + $0x1b0] sm:$0xff]  ;;  %v1175_v52 = vld [vmem:[#allocation5 + $0x1a8] sm:$0xff]  ;;  %v1174_v56 = vld [vmem:[#allocation5 + $0x1a0] sm:$0xff] }
  0x1e   :  { %656 = vmatpush.bf16.msra.mxu3 %v1150_v15  ;;  %v1184_v49 = vld [vmem:[#allocation5 + $0x1f0] sm:$0xff]  ;;  %v1183_v53 = vld [vmem:[#allocation5 + $0x1e8] sm:$0xff]  ;;  %v1182_v57 = vld [vmem:[#allocation5 + $0x1e0] sm:$0xff] }
  0x1f   :  { %618 = vmatpush.bf16.msra.mxu0 %v1125_v16  ;;  %v1157_v58 = vld [vmem:[#allocation5 + $0x118] sm:$0xff]  ;;  %v1156_v62 = vld [vmem:[#allocation5 + $0x110] sm:$0xff]  ;;  %v1155_v2 = vld [vmem:[#allocation5 + $0x108] sm:$0xff] }
  0x20   :  { %631 = vmatpush.bf16.msra.mxu1 %v1133_v17  ;;  %v1165_v59 = vld [vmem:[#allocation5 + $0x158] sm:$0xff]  ;;  %v1164_v63 = vld [vmem:[#allocation5 + $0x150] sm:$0xff]  ;;  %v1163_v3 = vld [vmem:[#allocation5 + $0x148] sm:$0xff] }
  0x21   :  { %644 = vmatpush.bf16.msra.mxu2 %v1141_v18  ;;  %v1173_v60 = vld [vmem:[#allocation5 + $0x198] sm:$0xff]  ;;  %v1172_v0 = vld [vmem:[#allocation5 + $0x190] sm:$0xff]  ;;  %v1171_v5 = vld [vmem:[#allocation5 + $0x188] sm:$0xff] }
  0x22   :  { %657 = vmatpush.bf16.msra.mxu3 %v1149_v19  ;;  %v1181_v61 = vld [vmem:[#allocation5 + $0x1d8] sm:$0xff]  ;;  %v1180_v1 = vld [vmem:[#allocation5 + $0x1d0] sm:$0xff]  ;;  %v1179_v6 = vld [vmem:[#allocation5 + $0x1c8] sm:$0xff] }
  0x23   :  { %619 = vmatpush.bf16.msra.mxu0 %v1124_v20  ;;  %v68_v4 = vld [vmem:[#allocation2 + $0x10] sm:$0xff]  ;;  %v69_v7 = vld [vmem:[#allocation2 + $0x18] sm:$0xff]  ;;  %v1154_v10 = vld [vmem:[#allocation5 + $0x100] sm:$0xff] }
  0x24   :  { %632 = vmatpush.bf16.msra.mxu1 %v1132_v21  ;;  %v210_v8 = vunpack.c.l.b16 %v68_v4  ;;  %v211_v9 = vunpack.c.h.b16 %v68_v4  ;;  %v1162_v11 = vld [vmem:[#allocation5 + $0x140] sm:$0xff]  ;;  %v212_v12 = vunpack.c.l.b16 %v69_v7  ;;  %v213_v13 = vunpack.c.h.b16 %v69_v7  ;;  %v1193_v20 = vld [vmem:[#allocation7 + $0x38] sm:$0xff]  ;;  %v1192_v21 = vld [vmem:[#allocation7 + $0x30] sm:$0xff] }
  0x25   :  { %645 = vmatpush.bf16.msra.mxu2 %v1140_v22  ;;  %v1170_v14 = vld [vmem:[#allocation5 + $0x180] sm:$0xff]  ;;  %v1191_v22 = vld [vmem:[#allocation7 + $0x28] sm:$0xff] }
  0x26   :  { %658 = vmatpush.bf16.msra.mxu3 %v1148_v23  ;;  %v1178_v15 = vld [vmem:[#allocation5 + $0x1c0] sm:$0xff]  ;;  %v218_v16 = vpack.c.b16 %v210_v8, %v210_v8  ;;  %v219_v17 = vpack.c.b16 %v211_v9, %v211_v9  ;;  %v220_v18 = vpack.c.b16 %v212_v12, %v212_v12  ;;  %v221_v19 = vpack.c.b16 %v213_v13, %v213_v13  ;;  %v1187_v28 = vld [vmem:[#allocation7 + $0x8] sm:$0xff] }
  0x27   :  { %620 = vmatpush.bf16.msra.mxu0 %v1123_v24  ;;  %v1190_v23 = vld [vmem:[#allocation7 + $0x20] sm:$0xff]  ;;  %v1189_v24 = vld [vmem:[#allocation7 + $0x18] sm:$0xff] }
  0x28   :  { %633 = vmatpush.bf16.msra.mxu1 %v1131_v25  ;;  %v1186_v32 = vld [vmem:[#allocation7] sm:$0xff] }
  0x29   :  { %646 = vmatpush.bf16.msra.mxu2 %v1139_v26  ;;  %v1188_v26 = vld [vmem:[#allocation7 + $0x10] sm:$0xff] }
  0x2a   :  { %659 = vmatpush.bf16.msra.mxu3 %v1147_v27 }
  0x2b   :  { %621 = vmatpush.bf16.msra.mxu0 %v1122_v30 }
  0x2c   :  { %634 = vmatpush.bf16.msra.mxu1 %v1130_v31 }
  0x2d   :  { %647 = vmatpush.bf16.msra.mxu2 %v1138_v34  ;;  %v1200_v34 = vld [vmem:[%s1364_s2] ss:$0 sm:$0xff] }
  0x2e   :  { %660 = vmatpush.bf16.msra.mxu3 %v1146_v35  ;;  %622 = vmatmul.bf16.vlgmr.msra.gmra.mxu0 %v214_v43 }
  0x2f   :  { %666 = vmatpush.bf16.msrb.mxu0 %v1161_v38  ;;  %635 = vmatmul.bf16.vlgmr.msra.gmra.mxu1 %v215_v45 }
  0x30   :  { %679 = vmatpush.bf16.msrb.mxu1 %v1169_v39  ;;  %648 = vmatmul.bf16.vlgmr.msra.gmra.mxu2 %v216_v42 }
  0x31   :  { %692 = vmatpush.bf16.msrb.mxu2 %v1177_v40  ;;  %661 = vmatmul.bf16.vlgmr.msra.gmra.mxu3 %v217_v44 }
  0x32   :  { %705 = vmatpush.bf16.msrb.mxu3 %v1185_v41 }
  0x33   :  { %667 = vmatpush.bf16.msrb.mxu0 %v1160_v46 }
  0x34   :  { %680 = vmatpush.bf16.msrb.mxu1 %v1168_v47 }
  0x35   :  { %693 = vmatpush.bf16.msrb.mxu2 %v1176_v48 }
  0x36   :  { %706 = vmatpush.bf16.msrb.mxu3 %v1184_v49 }
  0x37   :  { %668 = vmatpush.bf16.msrb.mxu0 %v1159_v50 }
  0x38   :  { %681 = vmatpush.bf16.msrb.mxu1 %v1167_v51 }
  0x39   :  { %694 = vmatpush.bf16.msrb.mxu2 %v1175_v52 }
  0x3a   :  { %707 = vmatpush.bf16.msrb.mxu3 %v1183_v53 }
  0x3b   :  { %669 = vmatpush.bf16.msrb.mxu0 %v1158_v54 }
  0x3c   :  { %682 = vmatpush.bf16.msrb.mxu1 %v1166_v55  ;;  %v801_v55 = vlaneseq }
  0x3d   :  { %695 = vmatpush.bf16.msrb.mxu2 %v1174_v56 }
  0x3e   :  { %708 = vmatpush.bf16.msrb.mxu3 %v1182_v57  ;;  %v802_v56 = vand.u32 127, %v801_v55  ;;  %v1201_v57 = vld [vmem:[%s1366_s4] ss:$0 sm:$0xff]  ;;  %s823_s4 = sshll.u32 %s1367_s5, 4  ;;  %s824_s4 = int_to_ptr.hbm [resolvable:$true] %s823_s4 }
  0x3f   :  { %670 = vmatpush.bf16.msrb.mxu0 %v1157_v58 }
  0x40   :  { %683 = vmatpush.bf16.msrb.mxu1 %v1165_v59  ;;  %vm803_vm0 = vcmp.lt.s32.totalorder %v802_v56, 10 }
  0x41   :  { %696 = vmatpush.bf16.msrb.mxu2 %v1173_v60 }
  0x42   :  { %709 = vmatpush.bf16.msrb.mxu3 %v1181_v61 }
  0x43   :  { %671 = vmatpush.bf16.msrb.mxu0 %v1156_v62 }
  0x44   :  { %684 = vmatpush.bf16.msrb.mxu1 %v1164_v63 }
  0x45   :  { %697 = vmatpush.bf16.msrb.mxu2 %v1172_v0 }
  0x46   :  { %710 = vmatpush.bf16.msrb.mxu3 %v1180_v1 }
  0x47   :  { %672 = vmatpush.bf16.msrb.mxu0 %v1155_v2 }
  0x48   :  { %685 = vmatpush.bf16.msrb.mxu1 %v1163_v3 }
  0x49   :  { %698 = vmatpush.bf16.msrb.mxu2 %v1171_v5 }
  0x4a   :  { %711 = vmatpush.bf16.msrb.mxu3 %v1179_v6 }
  0x4b   :  { %673 = vmatpush.bf16.msrb.mxu0 %v1154_v10 }
  0x4c   :  { %686 = vmatpush.bf16.msrb.mxu1 %v1162_v11 }
  0x4d   :  { %699 = vmatpush.bf16.msrb.mxu2 %v1170_v14 }
  0x4e   :  { %712 = vmatpush.bf16.msrb.mxu3 %v1178_v15  ;;  %674 = vmatmul.bf16.vlgmr.msrb.gmra.mxu0 %v218_v16 }
  0x4f   :  { %687 = vmatmul.bf16.vlgmr.msrb.gmra.mxu1 %v219_v17  ;;  %788 = vmatpush.bf16.msra.mxu0 %v1193_v20 }
  0x50   :  { %700 = vmatmul.bf16.vlgmr.msrb.gmra.mxu2 %v220_v18 }
  0x51   :  { %713 = vmatmul.bf16.vlgmr.msrb.gmra.mxu3 %v221_v19 }
  0x53   :  { %789 = vmatpush.bf16.msra.mxu0 %v1192_v21 }
  0x57   :  { %790 = vmatpush.bf16.msra.mxu0 %v1191_v22 }
  0x5b   :  { %791 = vmatpush.bf16.msra.mxu0 %v1190_v23 }
  0x5f   :  { %792 = vmatpush.bf16.msra.mxu0 %v1189_v24 }
  0x63   :  { %793 = vmatpush.bf16.msra.mxu0 %v1188_v26 }
  0x67   :  { %794 = vmatpush.bf16.msra.mxu0 %v1187_v28 }
  0x6b   :  { %795 = vmatpush.bf16.msra.mxu0 %v1186_v32 }
  0xab   :  { %v623_v25 = vpop.f32.mrf.mxu0 }
  0xac   :  { %v636_v27 = vpop.f32.mrf.mxu1  ;;  %v624_v37 = vadd.f32 %v1200_v34, %v623_v25 }
  0xae   :  { %v637_v38 = vadd.f32 %v636_v27, %v624_v37 }
  0xb3   :  { %v649_v29 = vpop.f32.mrf.mxu2  ;;  %v625_v31 = vpop.f32.mrf.mxu0 }
  0xb4   :  { %v662_v30 = vpop.f32.mrf.mxu3  ;;  %v638_v33 = vpop.f32.mrf.mxu1  ;;  %v650_v39 = vadd.f32 %v649_v29, %v637_v38 }
  0xb6   :  { %v663_v40 = vadd.f32 %v662_v30, %v650_v39 }
  0xbb   :  { %v651_v35 = vpop.f32.mrf.mxu2 }
  0xbc   :  { %v664_v36 = vpop.f32.mrf.mxu3 }
  0xcb   :  { %v675_v41 = vpop.f32.mrf.mxu0 }
  0xcc   :  { %v688_v42 = vpop.f32.mrf.mxu1  ;;  %v676_v43 = vadd.f32 %v675_v41, %v663_v40 }
  0xce   :  { %v689_v44 = vadd.f32 %v688_v42, %v676_v43 }
  0xd3   :  { %v701_v45 = vpop.f32.mrf.mxu2  ;;  %v677_v48 = vpop.f32.mrf.mxu0 }
  0xd4   :  { %v714_v46 = vpop.f32.mrf.mxu3  ;;  %v702_v47 = vadd.f32 %v701_v45, %v689_v44  ;;  %v690_v49 = vpop.f32.mrf.mxu1 }
  0xd6   :  { %v715_v50 = vadd.f32 %v714_v46, %v702_v47 }
  0xd8   :  { %v718_v51 = vmax.f32 %v715_v50, 0.0 }
  0xda   :  { %v719_v52 = vpack.c.bf16 %v718_v51, %v718_v51 }
  0xdb   :  { %v703_v53 = vpop.f32.mrf.mxu2 }
  0xdc   :  { %v716_v54 = vpop.f32.mrf.mxu3  ;;  %796 = vmatmul.bf16.vlgmr.msra.gmra.mxu0 %v719_v52 }
 0x159   :  { %v797_v58 = vpop.f32.mrf.mxu0 }
 0x15a   :  { %v798_v59 = vadd.f32 %v1201_v57, %v797_v58 }
 0x15c   :  { %v804_v60 = vsel %vm803_vm0, %v798_v59, -1e+30 }
 0x15d   :  { %805 = vmax.xlane.f32.xlu0 %v804_v60 }
 0x161   :  { %v799_v61 = vpop.f32.mrf.mxu0 }
 0x1d0   :  { %v806_v62 = vpop.xlane.xlu0 %805 }
 0x1d1   :  { %v807_v63 = vsub.f32 %v804_v60, %v806_v62 }
 0x1d3   :  { %v808_v0 = vmul.f32 1.442695, %v807_v63 }
 0x1d5   :  { %1202 = vpow2.f32 %v808_v0 }
 0x1db   :  { %v1203_v1 = vpop.eup %1202 }
 0x1dc   :  { %810 = vadd.xlane.f32.xlu0 %v1203_v1 }
 0x24f   :  { %v811_v2 = vpop.xlane.xlu0 %810 }
 0x250   :  { %1204 = vlog2.f32 %v811_v2 }
 0x256   :  { %v1205_v3 = vpop.eup %1204 }
 0x257   :  { %v813_v4 = vmul.f32 0.6931472, %v1205_v3 }
 0x259   :  { %v814_v5 = vsub.f32 %v807_v63, %v813_v4 }
 0x25b   :  { %815 = vst [vmem:[#allocation8] sm:$0xff] %v814_v5 }
 0x25c   :  { %826 = dma.vmem_to_hbm [thread:$0]  %s822_s11, 128, %s824_s4, [#allocation4]  }
 0x25d   :  { %1306 = dma.done.wait [#allocation4], 128  }
 0x25e   :  { %1307 = vsyncadd [#allocation4], 4294967168 }
 0x25f   :  { %831 = vsyncpa [#allocation3], 1 }
 0x260   :  { %832 = vsyncpa [#allocation6], 1 }
 0x261   :  { %833 = vsyncpa [#allocation4], 1 }

</bundles_post_ra>
